<compile_context>
chip_gen: v7x
topology: tpu7x:2x2x1
jax: 0.10.0
libtpu: 0.0.40
codegen_flags: <defaults>
</compile_context>

<pallas_src>
import functools

import jax
import jax.numpy as jnp
from jax.experimental import pallas as pl
from jax.experimental.pallas import tpu as pltpu


LANE = 128                              # pad feature (last) dims to a multiple of this
SUBLANE = 8                             # f32 sublane tile: batch tiles are multiples of 8
MAX_TB = 2048                           # batch-tile cap
VMEM_TILE_BUDGET = 40 * 1024 * 1024     # bytes budgeted for tiles + weights (v7x-safe)
VMEM_LIMIT_BYTES = 48 * 1024 * 1024     # explicit scoped-VMEM limit (v7x: 64 MiB phys,
                                        # v5e default scoped is only 16 MiB)


def _round_up(n: int, m: int) -> int:
    return ((n + m - 1) // m) * m


def decoder_kernel(x_ref, w1_ref, b1_ref, w2_ref, b2_ref, w3_ref, b3_ref, o_ref):
    """Fused 3x (matmul + bias + ReLU) for one batch tile.

    Feature dims are padded to 128 lanes, so every dot uses full MXU width and the
    final store is lane-dense. Weights/biases are VMEM-resident across grid steps.
    """
    x = x_ref[...]

    h = jnp.dot(x, w1_ref[...], preferred_element_type=jnp.float32)
    h += b1_ref[...]
    h = jnp.maximum(h, 0.0)

    h = jnp.dot(h, w2_ref[...], preferred_element_type=jnp.float32)
    h += b2_ref[...]
    h = jnp.maximum(h, 0.0)

    h = jnp.dot(h, w3_ref[...], preferred_element_type=jnp.float32)
    h += b3_ref[...]
    h = jnp.maximum(h, 0.0)

    o_ref[...] = h.astype(o_ref.dtype)


def pad_decoder_params(params):
    """Pad hidden/output dims to multiples of 128 ONCE (hoisted out of the forward).

    Zero padding of weight columns/rows and biases + ReLU keeps padded lanes exactly
    zero, so results are bit-identical after the final slice.
    """
    w1, b1, w2, b2, w3, b3 = params
    hidden = w1.shape[1]
    num_input_feat = w3.shape[1]
    h_pad = _round_up(hidden, LANE)
    o_pad = _round_up(num_input_feat, LANE)

    w1p = jnp.pad(w1, ((0, 0), (0, h_pad - hidden)))
    b1p = jnp.pad(b1, ((0, 0), (0, h_pad - hidden)))
    w2p = jnp.pad(w2, ((0, h_pad - hidden), (0, h_pad - hidden)))
    b2p = jnp.pad(b2, ((0, 0), (0, h_pad - hidden)))
    w3p = jnp.pad(w3, ((0, h_pad - hidden), (0, o_pad - num_input_feat)))
    b3p = jnp.pad(b3, ((0, 0), (0, o_pad - num_input_feat)))
    return (w1p, b1p, w2p, b2p, w3p, b3p), num_input_feat


def _pick_batch_tile(batch: int, emb_dim: int, h_pad: int, o_pad: int,
                     itemsize: int = 4) -> int:
    """Largest batch tile that fits the VMEM budget (double-buffered x/out tiles,
    f32 intermediates, and 2x-buffered resident weights), capped at MAX_TB."""
    weight_bytes = 2 * itemsize * (
        emb_dim * h_pad + h_pad * h_pad + h_pad * o_pad + 2 * h_pad + o_pad)
    per_row = 2 * itemsize * (emb_dim + o_pad) + 2 * itemsize * h_pad
    budget = max(VMEM_TILE_BUDGET - weight_bytes, per_row * SUBLANE)
    tb = (budget // per_row) // SUBLANE * SUBLANE
    tb = max(SUBLANE, min(MAX_TB, tb, _round_up(batch, SUBLANE)))
    # v7x megacore: ensure >= 2 grid steps on the "parallel" batch axis when there is
    # enough batch to split across the two TensorCores.
    if pl.cdiv(batch, tb) == 1 and batch > 2 * SUBLANE:
        tb = _round_up(pl.cdiv(batch, 2), SUBLANE)
    return tb


@functools.partial(jax.jit, static_argnames=("out_features",))
def decoder_forward(x, padded_params, out_features):
    """Pallas-backed forward. x: (batch, emb_dim) f32 -> (batch, out_features) f32."""
    w1p, b1p, w2p, b2p, w3p, b3p = padded_params
    batch, emb_dim = x.shape
    h_pad = w1p.shape[1]
    o_pad = w3p.shape[1]

    tb = _pick_batch_tile(batch, emb_dim, h_pad, o_pad, x.dtype.itemsize)
    # No batch pad: Pallas masks the ragged last block; OOB rows never reach HBM.
    grid = (pl.cdiv(batch, tb),)

    out_padded = pl.pallas_call(
        decoder_kernel,
        out_shape=jax.ShapeDtypeStruct((batch, o_pad), jnp.float32),
        grid=grid,
        in_specs=[
            pl.BlockSpec((tb, emb_dim), lambda i: (i, 0)),      # x: tiled over batch
            pl.BlockSpec((emb_dim, h_pad), lambda i: (0, 0)),   # W1: VMEM-resident
            pl.BlockSpec((1, h_pad), lambda i: (0, 0)),         # b1
            pl.BlockSpec((h_pad, h_pad), lambda i: (0, 0)),     # W2
            pl.BlockSpec((1, h_pad), lambda i: (0, 0)),         # b2
            pl.BlockSpec((h_pad, o_pad), lambda i: (0, 0)),     # W3
            pl.BlockSpec((1, o_pad), lambda i: (0, 0)),         # b3
        ],
        out_specs=pl.BlockSpec((tb, o_pad), lambda i: (i, 0)),
        compiler_params=pltpu.CompilerParams(
            dimension_semantics=("parallel",),
            vmem_limit_bytes=VMEM_LIMIT_BYTES,
        ),
    )(x, w1p, b1p, w2p, b2p, w3p, b3p)

    return out_padded[:, :out_features]


def init_decoder_params(key, num_input_feat, emb_dim):
    """Deterministic parameter init mirroring nn.Linear shapes (weights transposed
    to (in, out) so the kernel computes y = x @ W + b)."""
    k1, k2, k3, k4, k5, k6 = jax.random.split(key, 6)
    hidden = 64
    w1 = jax.random.normal(k1, (emb_dim, hidden), jnp.float32) * 0.1
    b1 = jax.random.normal(k2, (1, hidden), jnp.float32) * 0.1
    w2 = jax.random.normal(k3, (hidden, hidden), jnp.float32) * 0.1
    b2 = jax.random.normal(k4, (1, hidden), jnp.float32) * 0.1
    w3 = jax.random.normal(k5, (hidden, num_input_feat), jnp.float32) * 0.1
    b3 = jax.random.normal(k6, (1, num_input_feat), jnp.float32) * 0.1
    return (w1, b1, w2, b2, w3, b3)


def decoder_reference(x, params):
    """Pure-JAX reference matching the PyTorch forward (ReLU after every layer)."""
    w1, b1, w2, b2, w3, b3 = params
    h = jnp.maximum(x @ w1 + b1, 0.0)
    h = jnp.maximum(h @ w2 + b2, 0.0)
    h = jnp.maximum(h @ w3 + b3, 0.0)
    return h


if __name__ == "__main__":
    batch = 8
    emb_dim = 32
    num_input_feat = 16

    key = jax.random.PRNGKey(0)
    k_x, k_p = jax.random.split(key)
    x = jax.random.normal(k_x, (batch, emb_dim), jnp.float32)
    params = init_decoder_params(k_p, num_input_feat, emb_dim)

    # Pad weights once (hoisted out of the per-call forward).
    padded_params, out_features = pad_decoder_params(params)

    out = decoder_forward(x, padded_params, out_features)
    out = jax.block_until_ready(out)

    ref = decoder_reference(x, params)
    assert out.shape == (batch, num_input_feat), out.shape
    assert jnp.allclose(out, ref, atol=1e-5, rtol=1e-5), "mismatch vs reference"

    print("KERNEL_OK")
</pallas_src>

<mosaic_0001>
module attributes {stable_mosaic.version = 11 : i64} {
  func.func @decoder_kernel(%arg0: i32, %arg1: memref<8x32xf32, #tpu.memory_space<vmem>>, %arg2: memref<32x128xf32, #tpu.memory_space<vmem>>, %arg3: memref<1x128xf32, #tpu.memory_space<vmem>>, %arg4: memref<128x128xf32, #tpu.memory_space<vmem>>, %arg5: memref<1x128xf32, #tpu.memory_space<vmem>>, %arg6: memref<128x128xf32, #tpu.memory_space<vmem>>, %arg7: memref<1x128xf32, #tpu.memory_space<vmem>>, %arg8: memref<8x128xf32, #tpu.memory_space<vmem>>) attributes {dimension_semantics = [#tpu.dimension_semantics<parallel>], iteration_bounds = array<i64: 1>, scalar_prefetch = 0 : i64, scratch_operands = 0 : i64, tpu.core_type = #tpu.core_type<tc>, window_params = [{transform_indices = @transform_0, window_bounds = array<i64: 8, 32>}, {pipeline_mode = #tpu.pipeline_mode<synchronous>, transform_indices = @transform_1, window_bounds = array<i64: 32, 128>}, {pipeline_mode = #tpu.pipeline_mode<synchronous>, transform_indices = @transform_2, window_bounds = array<i64: 1, 128>}, {pipeline_mode = #tpu.pipeline_mode<synchronous>, transform_indices = @transform_3, window_bounds = array<i64: 128, 128>}, {pipeline_mode = #tpu.pipeline_mode<synchronous>, transform_indices = @transform_4, window_bounds = array<i64: 1, 128>}, {pipeline_mode = #tpu.pipeline_mode<synchronous>, transform_indices = @transform_5, window_bounds = array<i64: 128, 128>}, {pipeline_mode = #tpu.pipeline_mode<synchronous>, transform_indices = @transform_6, window_bounds = array<i64: 1, 128>}, {transform_indices = @transform_7, window_bounds = array<i64: 8, 128>}]} {
    %c0 = arith.constant 0 : index
    %c0_0 = arith.constant 0 : index
    %0 = vector.load %arg1[%c0, %c0_0] : memref<8x32xf32, #tpu.memory_space<vmem>>, vector<8x32xf32>
    %c0_1 = arith.constant 0 : index
    %c0_2 = arith.constant 0 : index
    %1 = vector.load %arg2[%c0_1, %c0_2] : memref<32x128xf32, #tpu.memory_space<vmem>>, vector<32x128xf32>
    %cst = arith.constant dense<0.000000e+00> : vector<8x128xf32>
    %2 = tpu.matmul %0, %1, %cst {dimension_numbers = #tpu.dot_dimension_numbers<[1], [0], [0], [1], [0, 0, 1, 1], [], []>} : vector<8x32xf32>, vector<32x128xf32>, vector<8x128xf32> -> vector<8x128xf32>
    %c0_3 = arith.constant 0 : index
    %c0_4 = arith.constant 0 : index
    %3 = vector.load %arg3[%c0_3, %c0_4] : memref<1x128xf32, #tpu.memory_space<vmem>>, vector<1x128xf32>
    %4 = vector.broadcast %3 : vector<1x128xf32> to vector<8x128xf32>
    %5 = arith.addf %2, %4 : vector<8x128xf32>
    %cst_5 = arith.constant 0.000000e+00 : f32
    %6 = vector.broadcast %cst_5 : f32 to vector<8x128xf32>
    %7 = arith.maximumf %5, %6 : vector<8x128xf32>
    %c0_6 = arith.constant 0 : index
    %c0_7 = arith.constant 0 : index
    %8 = vector.load %arg4[%c0_6, %c0_7] : memref<128x128xf32, #tpu.memory_space<vmem>>, vector<128x128xf32>
    %cst_8 = arith.constant dense<0.000000e+00> : vector<8x128xf32>
    %9 = tpu.matmul %7, %8, %cst_8 {dimension_numbers = #tpu.dot_dimension_numbers<[1], [0], [0], [1], [0, 0, 1, 1], [], []>} : vector<8x128xf32>, vector<128x128xf32>, vector<8x128xf32> -> vector<8x128xf32>
    %c0_9 = arith.constant 0 : index
    %c0_10 = arith.constant 0 : index
    %10 = vector.load %arg5[%c0_9, %c0_10] : memref<1x128xf32, #tpu.memory_space<vmem>>, vector<1x128xf32>
    %11 = vector.broadcast %10 : vector<1x128xf32> to vector<8x128xf32>
    %12 = arith.addf %9, %11 : vector<8x128xf32>
    %cst_11 = arith.constant 0.000000e+00 : f32
    %13 = vector.broadcast %cst_11 : f32 to vector<8x128xf32>
    %14 = arith.maximumf %12, %13 : vector<8x128xf32>
    %c0_12 = arith.constant 0 : index
    %c0_13 = arith.constant 0 : index
    %15 = vector.load %arg6[%c0_12, %c0_13] : memref<128x128xf32, #tpu.memory_space<vmem>>, vector<128x128xf32>
    %cst_14 = arith.constant dense<0.000000e+00> : vector<8x128xf32>
    %16 = tpu.matmul %14, %15, %cst_14 {dimension_numbers = #tpu.dot_dimension_numbers<[1], [0], [0], [1], [0, 0, 1, 1], [], []>} : vector<8x128xf32>, vector<128x128xf32>, vector<8x128xf32> -> vector<8x128xf32>
    %c0_15 = arith.constant 0 : index
    %c0_16 = arith.constant 0 : index
    %17 = vector.load %arg7[%c0_15, %c0_16] : memref<1x128xf32, #tpu.memory_space<vmem>>, vector<1x128xf32>
    %18 = vector.broadcast %17 : vector<1x128xf32> to vector<8x128xf32>
    %19 = arith.addf %16, %18 : vector<8x128xf32>
    %cst_17 = arith.constant 0.000000e+00 : f32
    %20 = vector.broadcast %cst_17 : f32 to vector<8x128xf32>
    %21 = arith.maximumf %19, %20 : vector<8x128xf32>
    %c0_18 = arith.constant 0 : index
    %c0_19 = arith.constant 0 : index
    %22 = vector.load %arg8[%c0_18, %c0_19] : memref<8x128xf32, #tpu.memory_space<vmem>>, vector<8x128xf32>
    tpu.vector_store %arg8[%c0_18, %c0_19], %21 {strides = array<i32>} : memref<8x128xf32, #tpu.memory_space<vmem>>, vector<8x128xf32>,
    return
  }
  func.func @transform_0(%arg0: i32) -> (i32, i32) {
    %c0_i32 = arith.constant 0 : i32
    %c0_i32_0 = arith.constant 0 : i32
    return %arg0, %c0_i32 : i32, i32
  }
  func.func @transform_1(%arg0: i32) -> (i32, i32) {
    %c0_i32 = arith.constant 0 : i32
    %c0_i32_0 = arith.constant 0 : i32
    %c0_i32_1 = arith.constant 0 : i32
    return %c0_i32, %c0_i32_0 : i32, i32
  }
  func.func @transform_2(%arg0: i32) -> (i32, i32) {
    %c0_i32 = arith.constant 0 : i32
    %c0_i32_0 = arith.constant 0 : i32
    %c0_i32_1 = arith.constant 0 : i32
    return %c0_i32, %c0_i32_0 : i32, i32
  }
  func.func @transform_3(%arg0: i32) -> (i32, i32) {
    %c0_i32 = arith.constant 0 : i32
    %c0_i32_0 = arith.constant 0 : i32
    %c0_i32_1 = arith.constant 0 : i32
    return %c0_i32, %c0_i32_0 : i32, i32
  }
  func.func @transform_4(%arg0: i32) -> (i32, i32) {
    %c0_i32 = arith.constant 0 : i32
    %c0_i32_0 = arith.constant 0 : i32
    %c0_i32_1 = arith.constant 0 : i32
    return %c0_i32, %c0_i32_0 : i32, i32
  }
  func.func @transform_5(%arg0: i32) -> (i32, i32) {
    %c0_i32 = arith.constant 0 : i32
    %c0_i32_0 = arith.constant 0 : i32
    %c0_i32_1 = arith.constant 0 : i32
    return %c0_i32, %c0_i32_0 : i32, i32
  }
  func.func @transform_6(%arg0: i32) -> (i32, i32) {
    %c0_i32 = arith.constant 0 : i32
    %c0_i32_0 = arith.constant 0 : i32
    %c0_i32_1 = arith.constant 0 : i32
    return %c0_i32, %c0_i32_0 : i32, i32
  }
  func.func @transform_7(%arg0: i32) -> (i32, i32) {
    %c0_i32 = arith.constant 0 : i32
    %c0_i32_0 = arith.constant 0 : i32
    return %arg0, %c0_i32 : i32, i32
  }
}

</mosaic_0001>

<bundles_post_ra>
// kernel: decoder_forward.1
= control target key start
LH: loop header
LB: loop body
LE: loop exit
PB: predicated region body
PF: predicated region fallthrough
CT: control target
= control target key end

     0   :  { %12 = vsyncpa [#allocation3], 0  ;;  %s828_s0 = inlined_call_operand.hbm [shape: f32[8,32], index: 0, kind: input, shape index: {}]   ;;  %s829_s1 = inlined_call_operand.hbm [shape: f32[32,128], index: 1, kind: input, shape index: {}]   ;;  %s830_s2 = inlined_call_operand.vmem [shape: f32[1,128], index: 2, kind: input, shape index: {}]   ;;  %s831_s3 = inlined_call_operand.hbm [shape: f32[128,128], index: 3, kind: input, shape index: {}]   ;;  %s832_s4 = inlined_call_operand.vmem [shape: f32[1,128], index: 4, kind: input, shape index: {}]   ;;  %s833_s5 = inlined_call_operand.hbm [shape: f32[128,128], index: 5, kind: input, shape index: {}]   ;;  %s834_s6 = inlined_call_operand.vmem [shape: f32[1,128], index: 6, kind: input, shape index: {}]   ;;  %s835_s7 = inlined_call_operand.hbm [shape: f32[8,128], index: 7, kind: output, shape index: {}]  }
   0x1   :  { %13 = vsyncpa [#allocation6], 0 }
   0x2   :  { %14 = vsyncpa [#allocation9], 0 }
   0x3   :  { %15 = vsyncpa [#allocation4], 0  ;;  %s679_s24 = smov [#allocation5]   ;;  %s561_s28 = scalar_lea.hbm %s829_s1, 512 }
   0x4   :  { %s31_s25 = sshll.u32 %s679_s24, 4  ;;  %p562_p0 = scmp.ne.s32.totalorder %s829_s1, %s561_s28  ;;  %s32_s25 = int_to_ptr.vmem [resolvable:$true] %s31_s25 }
   0x5   :  { %p565_p1 = scmp.lt.u32.totalorder %s561_s28, %s829_s1 }
   0x7   :  { %p567_p2 = pnand %p565_p1, %p562_p0 }
   0x9   :  { %570 = shalt.err (!%p567_p2)
}
   0xa   :  { %s571_s10 = scalar_lea.vmem %s32_s25, 512  ;;  %p576_p4 = scmp.lt.s32.totalorder %s32_s25, %s32_s25 }
   0xb   :  { %p572_p3 = scmp.ne.s32.totalorder %s32_s25, %s571_s10  ;;  %p577_p5 = scmp.lt.s32.totalorder %s571_s10, %s571_s10 }
   0xd   :  { %p578_p6 = por %p577_p5, %p576_p4 }
   0xf   :  { %p579_p7 = pnand %p578_p6, %p572_p3 }
  0x11   :  { %582 = shalt.err (!%p579_p7)
}
  0x12   :  { %s680_s11 = smov 128   ;;  %s681_s12 = smov 8  }
  0x13   :  { %37 = dma.hbm_to_vmem [thread:$0]  %s829_s1, 512, %s32_s25, [#allocation6], %s680_s11, %s680_s11, %s681_s12  }
  0x14   :  { %s682_s15 = smov [#allocation2]   ;;  %s683_s17 = smov [#allocation7]  }
  0x15   :  { %s22_s16 = sshll.u32 %s682_s15, 4  ;;  %s45_s18 = sshll.u32 %s683_s17, 4  ;;  %s23_s16 = int_to_ptr.vmem [resolvable:$true] %s22_s16  ;;  %s46_s18 = int_to_ptr.vmem [resolvable:$true] %s45_s18 }
  0x16   :  { %s583_s21 = scalar_lea.hbm %s828_s0, 128 }
  0x17   :  { %p584_p8 = scmp.ne.s32.totalorder %s828_s0, %s583_s21  ;;  %p587_p9 = scmp.lt.u32.totalorder %s583_s21, %s828_s0 }
  0x19   :  { %p589_p10 = pnand %p587_p9, %p584_p8 }
  0x1b   :  { %592 = shalt.err (!%p589_p10)
}
  0x1c   :  { %s593_s1 = scalar_lea.vmem %s23_s16, 128  ;;  %p598_p12 = scmp.lt.s32.totalorder %s23_s16, %s23_s16 }
  0x1d   :  { %p594_p11 = scmp.ne.s32.totalorder %s23_s16, %s593_s1  ;;  %p599_p13 = scmp.lt.s32.totalorder %s593_s1, %s593_s1 }
  0x1f   :  { %p600_p0 = por %p599_p13, %p598_p12 }
  0x21   :  { %p601_p1 = pnand %p600_p0, %p594_p11 }
  0x23   :  { %604 = shalt.err (!%p601_p1)
}
  0x24   :  { %25 = dma.hbm_to_vmem [thread:$0]  %s828_s0, 128, %s23_s16, [#allocation3]  }
  0x25   :  { %s605_s30 = scalar_lea.hbm %s831_s3, 2048 }
  0x26   :  { %p606_p2 = scmp.ne.s32.totalorder %s831_s3, %s605_s30  ;;  %p609_p3 = scmp.lt.u32.totalorder %s605_s30, %s831_s3 }
  0x28   :  { %p611_p4 = pnand %p609_p3, %p606_p2 }
  0x2a   :  { %614 = shalt.err (!%p611_p4)
}
  0x2b   :  { %s615_s14 = scalar_lea.vmem %s46_s18, 2048  ;;  %p620_p6 = scmp.lt.s32.totalorder %s46_s18, %s46_s18 }
  0x2c   :  { %p616_p5 = scmp.ne.s32.totalorder %s46_s18, %s615_s14  ;;  %p621_p7 = scmp.lt.s32.totalorder %s615_s14, %s615_s14 }
  0x2e   :  { %p622_p8 = por %p621_p7, %p620_p6 }
  0x30   :  { %p623_p9 = pnand %p622_p8, %p616_p5 }
  0x32   :  { %626 = shalt.err (!%p623_p9)
}
  0x33   :  { %51 = dma.hbm_to_vmem [thread:$0]  %s831_s3, 2048, %s46_s18, [#allocation6], %s680_s11, %s680_s11, %s681_s12  }
  0x34   :  { %s684_s16 = smov [#allocation8]   ;;  %s627_s21 = scalar_lea.hbm %s833_s5, 2048 }
  0x35   :  { %s59_s17 = sshll.u32 %s684_s16, 4  ;;  %p628_p10 = scmp.ne.s32.totalorder %s833_s5, %s627_s21  ;;  %s60_s17 = int_to_ptr.vmem [resolvable:$true] %s59_s17 }
  0x36   :  { %p631_p11 = scmp.lt.u32.totalorder %s627_s21, %s833_s5 }
  0x38   :  { %p633_p12 = pnand %p631_p11, %p628_p10 }
  0x3a   :  { %636 = shalt.err (!%p633_p12)
}
  0x3b   :  { %s637_s1 = scalar_lea.vmem %s60_s17, 2048  ;;  %p642_p0 = scmp.lt.s32.totalorder %s60_s17, %s60_s17 }
  0x3c   :  { %p638_p13 = scmp.ne.s32.totalorder %s60_s17, %s637_s1  ;;  %p643_p1 = scmp.lt.s32.totalorder %s637_s1, %s637_s1 }
  0x3e   :  { %p644_p2 = por %p643_p1, %p642_p0 }
  0x40   :  { %p645_p3 = pnand %p644_p2, %p638_p13 }
  0x42   :  { %648 = shalt.err (!%p645_p3)
}
  0x43   :  { %65 = dma.hbm_to_vmem [thread:$0]  %s833_s5, 2048, %s60_s17, [#allocation9], %s680_s11, %s680_s11, %s681_s12  }
  0x44   :  { %671 = dma.done.wait [#allocation3], 128  }
  0x45   :  { %672 = vsyncadd [#allocation3], 4294967168 }
  0x46   :  { %673 = dma.done.wait [#allocation6], 2560  }
  0x47   :  { %674 = vsyncadd [#allocation6], 4294964736 }
  0x48   :  { %675 = dma.done.wait [#allocation9], 2048  }
  0x49   :  { %676 = vsyncadd [#allocation9], 4294965248  ;;  %v685_v0 = vmov 0.0|0.0   ;;  %vm686_vm0 = vmmov 0   ;;  %v687_v1 = vmov 0.0   ;;  %v81_v2 = vld [vmem:[#allocation5] sm:$0xff] }
  0x4a   :  { %497 = vmatprep.subr.bf16.mxu0 %v685_v0  ;;  %424 = vmatprep.mubr.msk.f32.mxu0 %vm686_vm0, %v687_v1  ;;  %v82_v3 = vld [vmem:[#allocation5 + $0x8] sm:$0xff]  ;;  %v83_v4 = vld [vmem:[#allocation5 + $0x10] sm:$0xff]  ;;  %v84_v6 = vld [vmem:[#allocation5 + $0x18] sm:$0xff]  ;;  %vm92_vm1 = vcmask 261120   ;;  %s688_s28 = smov [#allocation10]  }
  0x4b   :  { %503 = vmatprep.subr.bf16.mxu1 %v685_v0  ;;  %459 = vmatprep.mubr.msk.f32.mxu1 %vm686_vm0, %v687_v1  ;;  %v498_v5 = vpack.c.bf16 %v82_v3, %v81_v2  ;;  %v167_v7 = vld [vmem:[#allocation7] sm:$0xff]  ;;  %v168_v8 = vld [vmem:[#allocation7 + $0x8] sm:$0xff]  ;;  %v169_v9 = vld [vmem:[#allocation7 + $0x10] sm:$0xff]  ;;  %v501_v11 = vpack.c.bf16 %v84_v6, %v83_v4  ;;  %s362_s29 = sshll.u32 %s688_s28, 4  ;;  %s363_s29 = int_to_ptr.vmem [resolvable:$true] %s362_s29 }
  0x4c   :  { %v170_v10 = vld [vmem:[#allocation7 + $0x18] sm:$0xff]  ;;  %v504_v12 = vpack.c.bf16 %v168_v8, %v167_v7  ;;  %v171_v14 = vld [vmem:[#allocation7 + $0x20] sm:$0xff]  ;;  %v172_v15 = vld [vmem:[#allocation7 + $0x28] sm:$0xff]  ;;  %s649_s30 = scalar_lea.vmem %s363_s29, 128  ;;  %p654_p5 = scmp.lt.s32.totalorder %s363_s29, %s363_s29 }
  0x4d   :  { %499 = vmatpush3.bf16.msra.mxu0 %v498_v5  ;;  %v507_v13 = vpack.c.bf16 %v170_v10, %v169_v9  ;;  %v80_v16 = vld [vmem:[#allocation2] sm:$0xff]  ;;  %v510_v17 = vpack.c.bf16 %v172_v15, %v171_v14  ;;  %v173_v18 = vld [vmem:[#allocation7 + $0x30] sm:$0xff]  ;;  %v175_v21 = vld [vmem:[#allocation7 + $0x40] sm:$0xff]  ;;  %p650_p4 = scmp.ne.s32.totalorder %s363_s29, %s649_s30  ;;  %p655_p6 = scmp.lt.s32.totalorder %s649_s30, %s649_s30 }
  0x4e   :  { %500 = vmatprep.subr.bf16.mxu0 %v685_v0  ;;  %505 = vmatpush3.bf16.msra.mxu1 %v504_v12  ;;  %v174_v19 = vld [vmem:[#allocation7 + $0x38] sm:$0xff]  ;;  %v176_v22 = vld [vmem:[#allocation7 + $0x48] sm:$0xff]  ;;  %v177_v24 = vld [vmem:[#allocation7 + $0x50] sm:$0xff] }
  0x4f   :  { %506 = vmatprep.subr.bf16.mxu1 %v685_v0  ;;  %v513_v20 = vpack.c.bf16 %v174_v19, %v173_v18  ;;  %v516_v23 = vpack.c.bf16 %v176_v22, %v175_v21  ;;  %v178_v25 = vld [vmem:[#allocation7 + $0x58] sm:$0xff]  ;;  %v179_v27 = vld [vmem:[#allocation7 + $0x60] sm:$0xff]  ;;  %v180_v28 = vld [vmem:[#allocation7 + $0x68] sm:$0xff]  ;;  %p656_p7 = por %p655_p6, %p654_p5 }
  0x50   :  { %v519_v26 = vpack.c.bf16 %v178_v25, %v177_v24  ;;  %v522_v29 = vpack.c.bf16 %v180_v28, %v179_v27  ;;  %v181_v30 = vld [vmem:[#allocation7 + $0x70] sm:$0xff]  ;;  %v182_v31 = vld [vmem:[#allocation7 + $0x78] sm:$0xff]  ;;  %v261_v33 = vld [vmem:[#allocation8] sm:$0xff] }
  0x51   :  { %502 = vmatpush3.bf16.msra.mxu0 %v501_v11  ;;  %v525_v32 = vpack.c.bf16 %v182_v31, %v181_v30  ;;  %v262_v34 = vld [vmem:[#allocation8 + $0x8] sm:$0xff]  ;;  %v263_v35 = vld [vmem:[#allocation8 + $0x10] sm:$0xff]  ;;  %v264_v37 = vld [vmem:[#allocation8 + $0x18] sm:$0xff]  ;;  %p657_p8 = pnand %p656_p7, %p650_p4 }
  0x52   :  { %527 = vmatprep.subr.bf16.mxu0 %v685_v0  ;;  %508 = vmatpush3.bf16.msra.mxu1 %v507_v13  ;;  %v528_v36 = vpack.c.bf16 %v262_v34, %v261_v33  ;;  %v531_v38 = vpack.c.bf16 %v264_v37, %v263_v35  ;;  %v265_v39 = vld [vmem:[#allocation8 + $0x20] sm:$0xff]  ;;  %v266_v40 = vld [vmem:[#allocation8 + $0x28] sm:$0xff]  ;;  %v267_v42 = vld [vmem:[#allocation8 + $0x30] sm:$0xff] }
  0x53   :  { %509 = vmatprep.subr.bf16.mxu1 %v685_v0  ;;  %v534_v41 = vpack.c.bf16 %v266_v40, %v265_v39  ;;  %v268_v43 = vld [vmem:[#allocation8 + $0x38] sm:$0xff]  ;;  %v269_v45 = vld [vmem:[#allocation8 + $0x40] sm:$0xff]  ;;  %v270_v46 = vld [vmem:[#allocation8 + $0x48] sm:$0xff] }
  0x54   :  { %425 = vmatmul.mubr.msk.f32.vlgmr.msra.gmra.mrb[0].mxu0 %vm92_vm1, %v80_v16  ;;  %v537_v44 = vpack.c.bf16 %v268_v43, %v267_v42  ;;  %v540_v47 = vpack.c.bf16 %v270_v46, %v269_v45  ;;  %v271_v48 = vld [vmem:[#allocation8 + $0x50] sm:$0xff]  ;;  %v272_v49 = vld [vmem:[#allocation8 + $0x58] sm:$0xff]  ;;  %v273_v51 = vld [vmem:[#allocation8 + $0x60] sm:$0xff] }
  0x55   :  { %494 = vmatprep.mubr.msk.f32.mxu0 %vm686_vm0, %v687_v1  ;;  %529 = vmatpush3.bf16.msra.mxu0 %v528_v36  ;;  %v543_v50 = vpack.c.bf16 %v272_v49, %v271_v48  ;;  %v274_v52 = vld [vmem:[#allocation8 + $0x68] sm:$0xff]  ;;  %v373_v54 = vld [vmem:[%s830_s2] ss:$0 sm:$0xff]  ;;  %v275_v59 = vld [vmem:[#allocation8 + $0x70] sm:$0xff] }
  0x56   :  { %511 = vmatpush3.bf16.msra.mxu1 %v510_v17  ;;  %530 = vmatprep.subr.bf16.mxu0 %v685_v0  ;;  %v546_v53 = vpack.c.bf16 %v274_v52, %v273_v51  ;;  %v276_v60 = vld [vmem:[#allocation8 + $0x78] sm:$0xff] }
  0x57   :  { %512 = vmatprep.subr.bf16.mxu1 %v685_v0  ;;  %v549_v61 = vpack.c.bf16 %v276_v60, %v275_v59  ;;  %v375_v62 = vld [vmem:[%s832_s4] ss:$0 sm:$0xff] }
  0x58   :  { %v376_v3 = vld [vmem:[%s834_s6] ss:$0 sm:$0xff] }
  0x59   :  { %532 = vmatpush3.bf16.msra.mxu0 %v531_v38 }
  0x5a   :  { %514 = vmatpush3.bf16.msra.mxu1 %v513_v20  ;;  %533 = vmatprep.subr.bf16.mxu0 %v685_v0 }
  0x5b   :  { %515 = vmatprep.subr.bf16.mxu1 %v685_v0 }
  0x5d   :  { %535 = vmatpush3.bf16.msra.mxu0 %v534_v41 }
  0x5e   :  { %517 = vmatpush3.bf16.msra.mxu1 %v516_v23  ;;  %536 = vmatprep.subr.bf16.mxu0 %v685_v0 }
  0x5f   :  { %518 = vmatprep.subr.bf16.mxu1 %v685_v0 }
  0x61   :  { %538 = vmatpush3.bf16.msra.mxu0 %v537_v44 }
  0x62   :  { %520 = vmatpush3.bf16.msra.mxu1 %v519_v26  ;;  %539 = vmatprep.subr.bf16.mxu0 %v685_v0 }
  0x63   :  { %521 = vmatprep.subr.bf16.mxu1 %v685_v0 }
  0x65   :  { %541 = vmatpush3.bf16.msra.mxu0 %v540_v47 }
  0x66   :  { %523 = vmatpush3.bf16.msra.mxu1 %v522_v29  ;;  %542 = vmatprep.subr.bf16.mxu0 %v685_v0 }
  0x67   :  { %524 = vmatprep.subr.bf16.mxu1 %v685_v0 }
  0x69   :  { %544 = vmatpush3.bf16.msra.mxu0 %v543_v50 }
  0x6a   :  { %526 = vmatpush3.bf16.msra.mxu1 %v525_v32  ;;  %545 = vmatprep.subr.bf16.mxu0 %v685_v0 }
  0x6d   :  { %547 = vmatpush3.bf16.msra.mxu0 %v546_v53 }
  0x6e   :  { %548 = vmatprep.subr.bf16.mxu0 %v685_v0 }
  0x71   :  { %550 = vmatpush3.bf16.msra.mxu0 %v549_v61 }
 0x127   :  { %v162_v55 = vpop.f32.mrb[0].mxu0 }
 0x128   :  { %v163_v56 = vadd.f32 %v373_v54, %v162_v55  ;;  %v426_v57 = vpop.f32.mrb[1].mxu0 }
 0x12a   :  { %v166_v58 = vmax.f32 %v163_v56, 0.0 }
 0x12c   :  { %460 = vmatmul.mubr.f32.vlgmr.msra.gmra.mrb[0].mxu1 %v166_v58 }
 0x1ff   :  { %v256_v63 = vpop.f32.mrb[0].mxu1 }
 0x200   :  { %v257_v1 = vadd.f32 %v375_v62, %v256_v63  ;;  %v461_v0 = vpop.f32.mrb[1].mxu1 }
 0x202   :  { %v260_v2 = vmax.f32 %v257_v1, 0.0 }
 0x204   :  { %495 = vmatmul.mubr.f32.vlgmr.msra.gmra.mrb[2].mxu0 %v260_v2 }
 0x2d7   :  { %v350_v4 = vpop.f32.mrb[2].mxu0 }
 0x2d8   :  { %v351_v5 = vadd.f32 %v376_v3, %v350_v4  ;;  %v496_v6 = vpop.f32.mrb[3].mxu0 }
 0x2da   :  { %v354_v7 = vmax.f32 %v351_v5, 0.0 }
 0x2dc   :  { %355 = vst [vmem:[#allocation10] sm:$0xff] %v354_v7 }
 0x2dd   :  { %660 = shalt.err (!%p657_p8)
}
 0x2de   :  { %s661_s9 = scalar_lea.hbm %s835_s7, 128 }
 0x2df   :  { %p662_p9 = scmp.ne.s32.totalorder %s835_s7, %s661_s9  ;;  %p665_p10 = scmp.lt.u32.totalorder %s661_s9, %s835_s7 }
 0x2e1   :  { %p667_p11 = pnand %p665_p10, %p662_p9 }
 0x2e3   :  { %670 = shalt.err (!%p667_p11)
}
 0x2e4   :  { %365 = dma.vmem_to_hbm [thread:$0]  %s363_s29, 128, %s835_s7, [#allocation4]  }
 0x2e5   :  { %677 = dma.done.wait [#allocation4], 128  }
 0x2e6   :  { %678 = vsyncadd [#allocation4], 4294967168 }
 0x2e7   :  { %369 = vsyncpa [#allocation3], 1 }
 0x2e8   :  { %370 = vsyncpa [#allocation6], 1 }
 0x2e9   :  { %371 = vsyncpa [#allocation9], 1 }
 0x2ea   :  { %372 = vsyncpa [#allocation4], 1 }

</bundles_post_ra>
